<compile_context>
chip_gen: v7x
topology: tpu7x:2x2x1
jax: 0.10.0
libtpu: 0.0.40
codegen_flags: <defaults>
</compile_context>

<pallas_src>
import functools

import jax
import jax.numpy as jnp
from jax.experimental import pallas as pl
from jax.experimental.pallas import tpu as pltpu

LANE = 128  # lane-dense output width


def _round_up(x, m):
    return (x + m - 1) // m * m


def _mlp_kernel(x_ref, w1_ref, b1_ref, w2_ref, b2_ref, w3_ref, b3_ref, out_ref):
    # In-kernel f32 -> bf16 cast of x (VPU work, hidden under MXU slack).
    x = x_ref[...].astype(jnp.bfloat16)

    # Linear(32 -> 128) + ReLU  (bf16 MXU operands, f32 accumulate/elementwise)
    h1 = jnp.dot(x, w1_ref[...], preferred_element_type=jnp.float32)
    h1 = jnp.maximum(h1 + b1_ref[...], 0.0)

    # Dropout(0.3): identity in eval mode.
    # BatchNorm1d(128): folded into (w2, b2) in the wrapper (exact).

    # Linear(128 -> 64) + ReLU
    h2 = jnp.dot(h1.astype(jnp.bfloat16), w2_ref[...],
                 preferred_element_type=jnp.float32)
    h2 = jnp.maximum(h2 + b2_ref[...], 0.0)

    # Dropout(0.2): identity in eval mode.
    # Linear(64 -> 16), zero-padded to 128 output lanes so the final store
    # is a lane-dense unmasked vst (writeback DMA is dense).
    out_ref[...] = (jnp.dot(h2.astype(jnp.bfloat16), w3_ref[...],
                            preferred_element_type=jnp.float32) + b3_ref[...])


def fold_params(params):
    """Fold the eval-mode BatchNorm affine into the second linear, zero-pad
    the last layer to 128 output lanes, and cast matmul operands to bf16
    (biases stay f32)."""
    w2f = params["w2"] * params["bn_scale"].reshape(-1, 1)
    b2f = params["b2"] + params["bn_shift"] @ params["w2"]

    out_dim = params["w3"].shape[1]
    pad = _round_up(out_dim, LANE) - out_dim
    w3p = jnp.pad(params["w3"], ((0, 0), (0, pad)))
    b3p = jnp.pad(params["b3"], ((0, 0), (0, pad)))

    return {
        "w1": params["w1"].astype(jnp.bfloat16),
        "b1": params["b1"].astype(jnp.float32),
        "w2": w2f.astype(jnp.bfloat16),
        "b2": b2f.astype(jnp.float32),
        "w3": w3p.astype(jnp.bfloat16),
        "b3": b3p.astype(jnp.float32),
    }


@functools.partial(jax.jit, static_argnames=("tb", "out_dim"))
def market_analysis_forward(x, folded, tb=2048, out_dim=16):
    """Run the fused MLP kernel. x: (B, input_dim) float32. Returns (B, out_dim) f32."""
    B, in_dim = x.shape
    hidden = folded["w1"].shape[1]
    h2_dim = folded["w2"].shape[1]
    out_pad = folded["w3"].shape[1]          # lane-padded output width (128)

    # Batch tile: at most `tb`, at least the (sublane-aligned) batch itself.
    TB = min(tb, _round_up(B, 8))
    grid = (pl.cdiv(B, TB),)                 # ragged tail handled by Pallas

    def resident(shape):
        # Weights/biases: same block every grid step -> resident in VMEM;
        # single-buffered since the block index never changes.
        return pl.BlockSpec(shape, lambda i: (0, 0),
                            pipeline_mode=pl.Buffered(1))

    flops = 2 * B * (in_dim * hidden + hidden * h2_dim + h2_dim * out_pad)
    bytes_accessed = int(
        B * in_dim * 4                       # x (f32, cast in-kernel)
        + B * out_pad * 4                    # out (f32, lane-dense)
        + (in_dim * hidden + hidden * h2_dim + h2_dim * out_pad) * 2  # weights bf16
        + (hidden + h2_dim + out_pad) * 4                              # biases f32
    )

    out = pl.pallas_call(
        _mlp_kernel,
        out_shape=jax.ShapeDtypeStruct((B, out_pad), jnp.float32),
        grid=grid,
        in_specs=[
            pl.BlockSpec((TB, in_dim), lambda i: (i, 0)),   # x: streamed per tile
            resident((in_dim, hidden)),                     # w1
            resident((1, hidden)),                          # b1
            resident((hidden, h2_dim)),                     # w2 (BN-folded)
            resident((1, h2_dim)),                          # b2 (BN-folded)
            resident((h2_dim, out_pad)),                    # w3 (lane-padded)
            resident((1, out_pad)),                         # b3 (lane-padded)
        ],
        out_specs=pl.BlockSpec((TB, out_pad), lambda i: (i, 0)),
        compiler_params=pltpu.CompilerParams(
            dimension_semantics=("parallel",),              # shard batch across TCs on v7x
            vmem_limit_bytes=40 * 1024 * 1024,              # > v5e 16 MiB default, < v7x 64 MiB phys
        ),
        cost_estimate=pl.CostEstimate(
            flops=flops, transcendentals=0, bytes_accessed=bytes_accessed),
    )(x, folded["w1"], folded["b1"], folded["w2"], folded["b2"],
      folded["w3"], folded["b3"])

    return out[:, :out_dim]


def init_params(key, input_dim=32, hidden_dim=128, out_dim=16, eps=1e-5):
    """Deterministic synthetic parameters matching the module's shapes (f32)."""
    ks = jax.random.split(key, 8)
    h2 = hidden_dim // 2

    def uniform_fan_in(k, shape, fan_in):
        bound = 1.0 / jnp.sqrt(fan_in)
        return jax.random.uniform(k, shape, jnp.float32, -bound, bound)

    w1 = uniform_fan_in(ks[0], (input_dim, hidden_dim), input_dim)
    b1 = uniform_fan_in(ks[1], (1, hidden_dim), input_dim)
    w2 = uniform_fan_in(ks[2], (hidden_dim, h2), hidden_dim)
    b2 = uniform_fan_in(ks[3], (1, h2), hidden_dim)
    w3 = uniform_fan_in(ks[4], (h2, out_dim), h2)
    b3 = uniform_fan_in(ks[5], (1, out_dim), h2)

    # BatchNorm1d(hidden_dim), eval mode: fold (gamma, beta, running stats)
    # into per-feature scale/shift. Synthetic, non-trivial gamma/beta.
    gamma = 1.0 + 0.1 * jax.random.normal(ks[6], (1, hidden_dim), jnp.float32)
    beta = 0.1 * jax.random.normal(ks[7], (1, hidden_dim), jnp.float32)
    running_mean = jnp.zeros((1, hidden_dim), jnp.float32)
    running_var = jnp.ones((1, hidden_dim), jnp.float32)

    bn_scale = gamma * jax.lax.rsqrt(running_var + eps)
    bn_shift = beta - running_mean * bn_scale

    return {
        "w1": w1, "b1": b1,
        "bn_scale": bn_scale, "bn_shift": bn_shift,
        "w2": w2, "b2": b2,
        "w3": w3, "b3": b3,
    }


def reference_forward(x, params):
    """Pure-JAX f32 reference of the same eval-mode forward (BN not folded)."""
    h1 = jnp.maximum(x @ params["w1"] + params["b1"], 0.0)
    h1 = h1 * params["bn_scale"] + params["bn_shift"]
    h2 = jnp.maximum(h1 @ params["w2"] + params["b2"], 0.0)
    return h2 @ params["w3"] + params["b3"]


if __name__ == "__main__":
    key = jax.random.PRNGKey(0)
    k_x, k_p, k_x2 = jax.random.split(key, 3)

    batch, input_dim, hidden_dim = 8, 32, 128
    x = jax.random.normal(k_x, (batch, input_dim), jnp.float32)
    params = init_params(k_p, input_dim=input_dim, hidden_dim=hidden_dim)
    folded = fold_params(params)

    out = jax.block_until_ready(market_analysis_forward(x, folded))
    ref = reference_forward(x, params)
    assert out.shape == (batch, 16)
    # bf16 MXU operands vs. f32 reference -> relaxed tolerance.
    assert jnp.allclose(out, ref, atol=5e-2, rtol=5e-2), \
        float(jnp.max(jnp.abs(out - ref)))

    # Exercise the multi-step grid + ragged tail block (non-multiple batch).
    x2 = jax.random.normal(k_x2, (300, input_dim), jnp.float32)
    out2 = jax.block_until_ready(market_analysis_forward(x2, folded, tb=128))
    ref2 = reference_forward(x2, params)
    assert out2.shape == (300, 16)
    assert jnp.allclose(out2, ref2, atol=5e-2, rtol=5e-2), \
        float(jnp.max(jnp.abs(out2 - ref2)))

    print("KERNEL_OK")
</pallas_src>

<mosaic_0001>
module attributes {stable_mosaic.version = 11 : i64} {
  func.func @_mlp_kernel(%arg0: i32, %arg1: memref<8x32xf32, #tpu.memory_space<vmem>>, %arg2: memref<32x128xbf16, #tpu.memory_space<vmem>>, %arg3: memref<1x128xf32, #tpu.memory_space<vmem>>, %arg4: memref<128x64xbf16, #tpu.memory_space<vmem>>, %arg5: memref<1x64xf32, #tpu.memory_space<vmem>>, %arg6: memref<64x128xbf16, #tpu.memory_space<vmem>>, %arg7: memref<1x128xf32, #tpu.memory_space<vmem>>, %arg8: memref<8x128xf32, #tpu.memory_space<vmem>>) attributes {dimension_semantics = [#tpu.dimension_semantics<parallel>], iteration_bounds = array<i64: 1>, scalar_prefetch = 0 : i64, scratch_operands = 0 : i64, tpu.core_type = #tpu.core_type<tc>, window_params = [{transform_indices = @transform_0, window_bounds = array<i64: 8, 32>}, {pipeline_mode = #tpu.pipeline_mode<synchronous>, transform_indices = @transform_1, window_bounds = array<i64: 32, 128>}, {pipeline_mode = #tpu.pipeline_mode<synchronous>, transform_indices = @transform_2, window_bounds = array<i64: 1, 128>}, {pipeline_mode = #tpu.pipeline_mode<synchronous>, transform_indices = @transform_3, window_bounds = array<i64: 128, 64>}, {pipeline_mode = #tpu.pipeline_mode<synchronous>, transform_indices = @transform_4, window_bounds = array<i64: 1, 64>}, {pipeline_mode = #tpu.pipeline_mode<synchronous>, transform_indices = @transform_5, window_bounds = array<i64: 64, 128>}, {pipeline_mode = #tpu.pipeline_mode<synchronous>, transform_indices = @transform_6, window_bounds = array<i64: 1, 128>}, {transform_indices = @transform_7, window_bounds = array<i64: 8, 128>}]} {
    %c0 = arith.constant 0 : index
    %c0_0 = arith.constant 0 : index
    %0 = vector.load %arg1[%c0, %c0_0] : memref<8x32xf32, #tpu.memory_space<vmem>>, vector<8x32xf32>
    %1 = arith.truncf %0 : vector<8x32xf32> to vector<8x32xbf16>
    %c0_1 = arith.constant 0 : index
    %c0_2 = arith.constant 0 : index
    %2 = vector.load %arg2[%c0_1, %c0_2] : memref<32x128xbf16, #tpu.memory_space<vmem>>, vector<32x128xbf16>
    %cst = arith.constant dense<0.000000e+00> : vector<8x128xf32>
    %3 = tpu.matmul %1, %2, %cst {dimension_numbers = #tpu.dot_dimension_numbers<[1], [0], [0], [1], [0, 0, 1, 1], [], []>} : vector<8x32xbf16>, vector<32x128xbf16>, vector<8x128xf32> -> vector<8x128xf32>
    %c0_3 = arith.constant 0 : index
    %c0_4 = arith.constant 0 : index
    %4 = vector.load %arg3[%c0_3, %c0_4] : memref<1x128xf32, #tpu.memory_space<vmem>>, vector<1x128xf32>
    %5 = vector.broadcast %4 : vector<1x128xf32> to vector<8x128xf32>
    %6 = arith.addf %3, %5 : vector<8x128xf32>
    %cst_5 = arith.constant 0.000000e+00 : f32
    %7 = vector.broadcast %cst_5 : f32 to vector<8x128xf32>
    %8 = arith.maximumf %6, %7 : vector<8x128xf32>
    %9 = arith.truncf %8 : vector<8x128xf32> to vector<8x128xbf16>
    %c0_6 = arith.constant 0 : index
    %c0_7 = arith.constant 0 : index
    %10 = vector.load %arg4[%c0_6, %c0_7] : memref<128x64xbf16, #tpu.memory_space<vmem>>, vector<128x64xbf16>
    %cst_8 = arith.constant dense<0.000000e+00> : vector<8x64xf32>
    %11 = tpu.matmul %9, %10, %cst_8 {dimension_numbers = #tpu.dot_dimension_numbers<[1], [0], [0], [1], [0, 0, 1, 1], [], []>} : vector<8x128xbf16>, vector<128x64xbf16>, vector<8x64xf32> -> vector<8x64xf32>
    %c0_9 = arith.constant 0 : index
    %c0_10 = arith.constant 0 : index
    %12 = vector.load %arg5[%c0_9, %c0_10] : memref<1x64xf32, #tpu.memory_space<vmem>>, vector<1x64xf32>
    %13 = vector.broadcast %12 : vector<1x64xf32> to vector<8x64xf32>
    %14 = arith.addf %11, %13 : vector<8x64xf32>
    %cst_11 = arith.constant 0.000000e+00 : f32
    %15 = vector.broadcast %cst_11 : f32 to vector<8x64xf32>
    %16 = arith.maximumf %14, %15 : vector<8x64xf32>
    %17 = arith.truncf %16 : vector<8x64xf32> to vector<8x64xbf16>
    %c0_12 = arith.constant 0 : index
    %c0_13 = arith.constant 0 : index
    %18 = vector.load %arg6[%c0_12, %c0_13] : memref<64x128xbf16, #tpu.memory_space<vmem>>, vector<64x128xbf16>
    %cst_14 = arith.constant dense<0.000000e+00> : vector<8x128xf32>
    %19 = tpu.matmul %17, %18, %cst_14 {dimension_numbers = #tpu.dot_dimension_numbers<[1], [0], [0], [1], [0, 0, 1, 1], [], []>} : vector<8x64xbf16>, vector<64x128xbf16>, vector<8x128xf32> -> vector<8x128xf32>
    %c0_15 = arith.constant 0 : index
    %c0_16 = arith.constant 0 : index
    %20 = vector.load %arg7[%c0_15, %c0_16] : memref<1x128xf32, #tpu.memory_space<vmem>>, vector<1x128xf32>
    %21 = vector.broadcast %20 : vector<1x128xf32> to vector<8x128xf32>
    %22 = arith.addf %19, %21 : vector<8x128xf32>
    %c0_17 = arith.constant 0 : index
    %c0_18 = arith.constant 0 : index
    %23 = vector.load %arg8[%c0_17, %c0_18] : memref<8x128xf32, #tpu.memory_space<vmem>>, vector<8x128xf32>
    tpu.vector_store %arg8[%c0_17, %c0_18], %22 {strides = array<i32>} : memref<8x128xf32, #tpu.memory_space<vmem>>, vector<8x128xf32>,
    return
  }
  func.func @transform_0(%arg0: i32) -> (i32, i32) {
    %c0_i32 = arith.constant 0 : i32
    %c0_i32_0 = arith.constant 0 : i32
    return %arg0, %c0_i32 : i32, i32
  }
  func.func @transform_1(%arg0: i32) -> (i32, i32) {
    %c0_i32 = arith.constant 0 : i32
    %c0_i32_0 = arith.constant 0 : i32
    %c0_i32_1 = arith.constant 0 : i32
    return %c0_i32, %c0_i32_0 : i32, i32
  }
  func.func @transform_2(%arg0: i32) -> (i32, i32) {
    %c0_i32 = arith.constant 0 : i32
    %c0_i32_0 = arith.constant 0 : i32
    %c0_i32_1 = arith.constant 0 : i32
    return %c0_i32, %c0_i32_0 : i32, i32
  }
  func.func @transform_3(%arg0: i32) -> (i32, i32) {
    %c0_i32 = arith.constant 0 : i32
    %c0_i32_0 = arith.constant 0 : i32
    %c0_i32_1 = arith.constant 0 : i32
    return %c0_i32, %c0_i32_0 : i32, i32
  }
  func.func @transform_4(%arg0: i32) -> (i32, i32) {
    %c0_i32 = arith.constant 0 : i32
    %c0_i32_0 = arith.constant 0 : i32
    %c0_i32_1 = arith.constant 0 : i32
    return %c0_i32, %c0_i32_0 : i32, i32
  }
  func.func @transform_5(%arg0: i32) -> (i32, i32) {
    %c0_i32 = arith.constant 0 : i32
    %c0_i32_0 = arith.constant 0 : i32
    %c0_i32_1 = arith.constant 0 : i32
    return %c0_i32, %c0_i32_0 : i32, i32
  }
  func.func @transform_6(%arg0: i32) -> (i32, i32) {
    %c0_i32 = arith.constant 0 : i32
    %c0_i32_0 = arith.constant 0 : i32
    %c0_i32_1 = arith.constant 0 : i32
    return %c0_i32, %c0_i32_0 : i32, i32
  }
  func.func @transform_7(%arg0: i32) -> (i32, i32) {
    %c0_i32 = arith.constant 0 : i32
    %c0_i32_0 = arith.constant 0 : i32
    return %arg0, %c0_i32 : i32, i32
  }
}

</mosaic_0001>

<bundles_post_ra>
// kernel: market_analysis_forward.1
= control target key start
LH: loop header
LB: loop body
LE: loop exit
PB: predicated region body
PF: predicated region fallthrough
CT: control target
= control target key end

     0   :  { %v427_v1 = vmov 0.0   ;;  %vm428_vm0 = vmmov 0   ;;  %vm53_vm1 = vcmask 261120   ;;  %s539_s0 = inlined_call_operand.vmem [shape: f32[8,32], index: 0, kind: input, shape index: {}]   ;;  %s540_s1 = inlined_call_operand.vmem [shape: bf16[32,128], index: 1, kind: input, shape index: {}]   ;;  %s541_s2 = inlined_call_operand.vmem [shape: f32[1,128], index: 2, kind: input, shape index: {}]   ;;  %s542_s3 = inlined_call_operand.vmem [shape: bf16[128,64], index: 3, kind: input, shape index: {}]   ;;  %s543_s4 = inlined_call_operand.vmem [shape: f32[1,64], index: 4, kind: input, shape index: {}]   ;;  %s544_s5 = inlined_call_operand.vmem [shape: bf16[64,128], index: 5, kind: input, shape index: {}]   ;;  %s545_s6 = inlined_call_operand.vmem [shape: f32[1,128], index: 6, kind: input, shape index: {}]   ;;  %s546_s7 = inlined_call_operand.hbm [shape: f32[8,128], index: 7, kind: output, shape index: {}]  }
   0x1   :  { %v389_v0 = vld [vmem:[%s540_s1] sm:$0xff]   ;;  %346 = vmatprep.subr.bf16.mxu0 %v427_v1  ;;  %v390_v2 = vld [vmem:[%s540_s1 + $0x8] sm:$0xff]   ;;  %354 = vmatprep.subr.bf16.mxu1 %v427_v1  ;;  %v393_v7 = vld [vmem:[%s542_s3 + $0x10] sm:$0xff]  }
   0x2   :  { %347 = vmatpush3.bf16.msra.mxu0 %v389_v0  ;;  %350 = vmatprep.mubr.msk.bf16.mxu0 %vm428_vm0, %v427_v1  ;;  %v28_v3 = vld [vmem:[%s539_s0] sm:$0xff]  ;;  %v392_v6 = vld [vmem:[%s542_s3 + $0x8] sm:$0xff]  }
   0x3   :  { %348 = vmatprep.subr.bf16.mxu0 %v427_v1  ;;  %v391_v4 = vld [vmem:[%s542_s3] sm:$0xff]   ;;  %370 = vmatprep.mubr.msk.bf16.mxu1 %vm428_vm0, %v427_v1  ;;  %v29_v5 = vpack.c.bf16 %v28_v3, %v28_v3 }
   0x4   :  { %355 = vmatpush3.bf16.msra.mxu1 %v391_v4 }
   0x5   :  { %356 = vmatprep.subr.bf16.mxu1 %v427_v1 }
   0x6   :  { %349 = vmatpush3.bf16.msra.mxu0 %v390_v2 }
   0x7   :  { %374 = vmatprep.subr.bf16.mxu0 %v427_v1 }
   0x8   :  { %357 = vmatpush3.bf16.msra.mxu1 %v392_v6 }
   0x9   :  { %351 = vmatmul.mubr.msk.bf16.vlgmr.msra.gmra.mrb[0].mxu0 %vm53_vm1, %v29_v5  ;;  %358 = vmatprep.subr.bf16.mxu1 %v427_v1 }
   0xa   :  { %382 = vmatprep.mubr.msk.bf16.mxu0 %vm428_vm0, %v427_v1 }
   0xb   :  { %12 = vsyncpa [#allocation3], 0  ;;  %v394_v8 = vld [vmem:[%s542_s3 + $0x18] sm:$0xff]   ;;  %v395_v9 = vld [vmem:[%s542_s3 + $0x20] sm:$0xff]   ;;  %vm251_vm2 = vcmask 523264   ;;  %s429_s1 = smov [#allocation2]  }
   0xc   :  { %359 = vmatpush3.bf16.msra.mxu1 %v393_v7  ;;  %v396_v10 = vld [vmem:[%s542_s3 + $0x28] sm:$0xff]   ;;  %v397_v11 = vld [vmem:[%s542_s3 + $0x30] sm:$0xff]   ;;  %v398_v12 = vld [vmem:[%s542_s3 + $0x38] sm:$0xff]  }
   0xd   :  { %360 = vmatprep.subr.bf16.mxu1 %v427_v1  ;;  %v399_v13 = vld [vmem:[%s544_s5] sm:$0xff]   ;;  %v400_v14 = vld [vmem:[%s544_s5 + $0x8] sm:$0xff]   ;;  %v401_v23 = vld [vmem:[%s544_s5 + $0x10] sm:$0xff]  }
   0xe   :  { %375 = vmatpush3.bf16.msra.mxu0 %v399_v13  ;;  %v310_v15 = vld [vmem:[%s541_s2] ss:$0 sm:$0xff]  ;;  %v402_v24 = vld [vmem:[%s544_s5 + $0x18] sm:$0xff]   ;;  %s302_s5 = sshll.u32 %s429_s1, 4  ;;  %s303_s5 = int_to_ptr.vmem [resolvable:$true] %s302_s5 }
   0xf   :  { %376 = vmatprep.subr.bf16.mxu0 %v427_v1  ;;  %v314_v25 = vld [vmem:[%s543_s4] ss:$0 sm:$0xff]  ;;  %s403_s4 = scalar_lea.vmem %s303_s5, 128  ;;  %p408_p1 = scmp.lt.s32.totalorder %s303_s5, %s303_s5 }
  0x10   :  { %361 = vmatpush3.bf16.msra.mxu1 %v394_v8  ;;  %v323_v33 = vld [vmem:[%s545_s6] ss:$0 sm:$0xff]  ;;  %p404_p0 = scmp.ne.s32.totalorder %s303_s5, %s403_s4  ;;  %p409_p2 = scmp.lt.s32.totalorder %s403_s4, %s403_s4 }
  0x11   :  { %362 = vmatprep.subr.bf16.mxu1 %v427_v1 }
  0x12   :  { %377 = vmatpush3.bf16.msra.mxu0 %v400_v14  ;;  %p410_p3 = por %p409_p2, %p408_p1 }
  0x13   :  { %378 = vmatprep.subr.bf16.mxu0 %v427_v1 }
  0x14   :  { %363 = vmatpush3.bf16.msra.mxu1 %v395_v9  ;;  %p411_p4 = pnand %p410_p3, %p404_p0 }
  0x15   :  { %364 = vmatprep.subr.bf16.mxu1 %v427_v1 }
  0x16   :  { %379 = vmatpush3.bf16.msra.mxu0 %v401_v23 }
  0x17   :  { %380 = vmatprep.subr.bf16.mxu0 %v427_v1 }
  0x18   :  { %365 = vmatpush3.bf16.msra.mxu1 %v396_v10 }
  0x19   :  { %366 = vmatprep.subr.bf16.mxu1 %v427_v1 }
  0x1a   :  { %381 = vmatpush3.bf16.msra.mxu0 %v402_v24 }
  0x1c   :  { %367 = vmatpush3.bf16.msra.mxu1 %v397_v11 }
  0x1d   :  { %368 = vmatprep.subr.bf16.mxu1 %v427_v1 }
  0x20   :  { %369 = vmatpush3.bf16.msra.mxu1 %v398_v12 }
  0xdc   :  { %v91_v16 = vpop.f32.mrb[0].mxu0 }
  0xdd   :  { %v92_v17 = vadd.f32 %v310_v15, %v91_v16  ;;  %v352_v18 = vpop.f32.mrb[1].mxu0 }
  0xde   :  { %v94_v19 = vpop.f32.mrb[2].mxu0 }
  0xdf   :  { %v97_v20 = vmax.f32 %v92_v17, 0.0  ;;  %v353_v21 = vpop.f32.mrb[3].mxu0 }
  0xe1   :  { %v98_v22 = vpack.c.bf16 %v97_v20, %v97_v20 }
  0xe3   :  { %371 = vmatmul.mubr.bf16.vlgmr.msra.gmra.mrb[0].mxu1 %v98_v22 }
 0x1b6   :  { %v204_v26 = vpop.f32.mrb[0].mxu1 }
 0x1b7   :  { %v205_v27 = vadd.f32 %v314_v25, %v204_v26  ;;  %v372_v28 = vpop.f32.mrb[1].mxu1 }
 0x1b8   :  { %v207_v29 = vpop.f32.mrb[2].mxu1 }
 0x1b9   :  { %v210_v30 = vmax.f32 %v205_v27, 0.0  ;;  %v373_v31 = vpop.f32.mrb[3].mxu1 }
 0x1bb   :  { %v211_v32 = vpack.c.bf16 %v210_v30, %v210_v30 }
 0x1bd   :  { %383 = vmatmul.mubr.msk.bf16.vlgmr.msra.gmra.mrb[4].mxu0 %vm251_vm2, %v211_v32 }
 0x290   :  { %v289_v34 = vpop.f32.mrb[4].mxu0 }
 0x291   :  { %v290_v35 = vadd.f32 %v323_v33, %v289_v34  ;;  %v384_v36 = vpop.f32.mrb[5].mxu0 }
 0x292   :  { %v292_v37 = vpop.f32.mrb[6].mxu0 }
 0x293   :  { %295 = vst [vmem:[#allocation2] sm:$0xff] %v290_v35  ;;  %v385_v38 = vpop.f32.mrb[7].mxu0 }
 0x294   :  { %414 = shalt.err (!%p411_p4)
}
 0x295   :  { %s415_s6 = scalar_lea.hbm %s546_s7, 128 }
 0x296   :  { %p416_p5 = scmp.ne.s32.totalorder %s546_s7, %s415_s6  ;;  %p419_p6 = scmp.lt.u32.totalorder %s415_s6, %s546_s7 }
 0x298   :  { %p421_p7 = pnand %p419_p6, %p416_p5 }
 0x29a   :  { %424 = shalt.err (!%p421_p7)
}
 0x29b   :  { %305 = dma.vmem_to_hbm [thread:$0]  %s303_s5, 128, %s546_s7, [#allocation3]  }
 0x29c   :  { %425 = dma.done.wait [#allocation3], 128  }
 0x29d   :  { %426 = vsyncadd [#allocation3], 4294967168 }
 0x29e   :  { %309 = vsyncpa [#allocation3], 1 }

</bundles_post_ra>
